<compile_context>
chip_gen: v7x
topology: tpu7x:2x2x1
jax: 0.10.0
libtpu: 0.0.40
codegen_flags: <defaults>
</compile_context>

<pallas_src>
import jax
import jax.numpy as jnp
from jax.experimental import pallas as pl
from jax.experimental.pallas import tpu as pltpu


def _round_up(x, m):
    return ((x + m - 1) // m) * m


def critic_kernel(obs_ref, act_ref,
                  w1o_ref, w1a_ref, b1_ref,
                  w2_ref, b2_ref,
                  w3_ref, b3_ref,
                  o_ref):
    """One batch tile of the fused 3-layer MLP.

    obs_ref : (TILE_B, repr_dim)    f32
    act_ref : (TILE_B, action_dim)  f32
    w1o_ref : (repr_dim, H)   bf16     w1a_ref : (action_dim, H) bf16
    b1_ref  : (1, H) f32
    w2_ref  : (H, H) bf16             b2_ref  : (1, H) f32
    w3_ref  : (1, H) f32 (final layer stored as a row)
    b3_ref  : (1, 1) f32
    o_ref   : (TILE_B, 1) f32
    """
    # Layer 1: split-input matmul (concat eliminated), bf16 MXU, f32 accumulate.
    obs16 = obs_ref[...].astype(jnp.bfloat16)
    act16 = act_ref[...].astype(jnp.bfloat16)
    h1 = (jnp.dot(obs16, w1o_ref[...], preferred_element_type=jnp.float32)
          + jnp.dot(act16, w1a_ref[...], preferred_element_type=jnp.float32)
          + b1_ref[...])
    h1 = jnp.maximum(h1, 0.0)

    # Layer 2: bf16 MXU, f32 accumulate; bias/ReLU on the f32 accumulator.
    h2 = jnp.dot(h1.astype(jnp.bfloat16), w2_ref[...],
                 preferred_element_type=jnp.float32) + b2_ref[...]
    h2 = jnp.maximum(h2, 0.0)

    # Layer 3 (H -> 1): VPU multiply + XLU lane reduction instead of an N=1 matmul.
    q = jnp.sum(h2 * w3_ref[...], axis=-1, keepdims=True) + b3_ref[...]
    o_ref[...] = q.astype(o_ref.dtype)


def critic_forward(obs, action, params, max_tile_b=512):
    """Fused critic forward: one pallas_call, batch-tiled grid, resident weights."""
    w1o, w1a, b1, w2, b2, w3, b3 = params
    B, repr_dim = obs.shape
    action_dim = action.shape[1]
    H = w1o.shape[1]

    # Pick a batch tile: large enough to amortize per-grid-step overhead,
    # small enough to keep double-buffered tiles + resident weights in VMEM
    # on all generations (v7x has only 64 MiB physical VMEM).
    tile_b = min(max_tile_b, _round_up(B, 8))
    b_pad = _round_up(B, tile_b)
    if b_pad != B:
        obs = jnp.pad(obs, ((0, b_pad - B), (0, 0)))
        action = jnp.pad(action, ((0, b_pad - B), (0, 0)))
    grid = (b_pad // tile_b,)

    resident = lambda shape: pl.BlockSpec(shape, lambda i: (0, 0))  # stays in VMEM

    out = pl.pallas_call(
        critic_kernel,
        out_shape=jax.ShapeDtypeStruct((b_pad, 1), jnp.float32),
        grid=grid,
        in_specs=[
            pl.BlockSpec((tile_b, repr_dim), lambda i: (i, 0)),
            pl.BlockSpec((tile_b, action_dim), lambda i: (i, 0)),
            resident(w1o.shape), resident(w1a.shape), resident(b1.shape),
            resident(w2.shape), resident(b2.shape),
            resident(w3.shape), resident(b3.shape),
        ],
        out_specs=pl.BlockSpec((tile_b, 1), lambda i: (i, 0)),
        compiler_params=pltpu.CompilerParams(
            dimension_semantics=("parallel",),  # shard batch tiles across TCs (v7x)
        ),
    )(obs, action, w1o, w1a, b1, w2, b2, w3, b3)

    return out[:B] if b_pad != B else out


def init_params(key, repr_dim, action_dim, hidden_dim):
    """Deterministic synthetic init (stand-in for utils.weight_init).

    MXU operands (w1_obs, w1_act, w2) are stored in bf16; biases and the
    final-layer row (VPU work) stay in f32.
    """
    ks = jax.random.split(key, 6)
    scale = lambda fan_in: 1.0 / jnp.sqrt(jnp.float32(fan_in))
    d_in = repr_dim + action_dim
    w1 = jax.random.normal(ks[0], (d_in, hidden_dim), jnp.float32) * scale(d_in)
    w1o = w1[:repr_dim].astype(jnp.bfloat16)
    w1a = w1[repr_dim:].astype(jnp.bfloat16)
    b1 = jax.random.normal(ks[1], (1, hidden_dim), jnp.float32) * 0.01
    w2 = (jax.random.normal(ks[2], (hidden_dim, hidden_dim), jnp.float32)
          * scale(hidden_dim)).astype(jnp.bfloat16)
    b2 = jax.random.normal(ks[3], (1, hidden_dim), jnp.float32) * 0.01
    w3 = jax.random.normal(ks[4], (1, hidden_dim), jnp.float32) * scale(hidden_dim)
    b3 = jax.random.normal(ks[5], (1, 1), jnp.float32) * 0.01
    return (w1o, w1a, b1, w2, b2, w3, b3)


def critic_ref(obs, action, params):
    """Pure-JAX reference with identical bf16/f32 mixed-precision semantics."""
    w1o, w1a, b1, w2, b2, w3, b3 = params
    h1 = (jnp.dot(obs.astype(jnp.bfloat16), w1o, preferred_element_type=jnp.float32)
          + jnp.dot(action.astype(jnp.bfloat16), w1a, preferred_element_type=jnp.float32)
          + b1)
    h1 = jnp.maximum(h1, 0.0)
    h2 = jnp.dot(h1.astype(jnp.bfloat16), w2,
                 preferred_element_type=jnp.float32) + b2
    h2 = jnp.maximum(h2, 0.0)
    return jnp.sum(h2 * w3, axis=-1, keepdims=True) + b3


if __name__ == "__main__":
    key = jax.random.PRNGKey(0)
    k_obs, k_act, k_par = jax.random.split(key, 3)

    batch = 8
    repr_dim = 32
    action_dim = 6
    hidden_dim = 32

    obs = jax.random.normal(k_obs, (batch, repr_dim), jnp.float32)
    action = jax.random.normal(k_act, (batch, action_dim), jnp.float32)
    params = init_params(k_par, repr_dim, action_dim, hidden_dim)

    q = critic_forward(obs, action, params)
    jax.block_until_ready(q)

    q_ref = critic_ref(obs, action, params)
    assert q.shape == (batch, 1)
    assert jnp.allclose(q, q_ref, atol=1e-3, rtol=1e-3)

    print("KERNEL_OK")
</pallas_src>

<mosaic_0001>
module attributes {stable_mosaic.version = 11 : i64} {
  func.func @critic_kernel(%arg0: i32, %arg1: memref<8x32xf32, #tpu.memory_space<vmem>>, %arg2: memref<8x6xf32, #tpu.memory_space<vmem>>, %arg3: memref<32x32xbf16, #tpu.memory_space<vmem>>, %arg4: memref<6x32xbf16, #tpu.memory_space<vmem>>, %arg5: memref<1x32xf32, #tpu.memory_space<vmem>>, %arg6: memref<32x32xbf16, #tpu.memory_space<vmem>>, %arg7: memref<1x32xf32, #tpu.memory_space<vmem>>, %arg8: memref<1x32xf32, #tpu.memory_space<vmem>>, %arg9: memref<1x1xf32, #tpu.memory_space<vmem>>, %arg10: memref<8x1xf32, #tpu.memory_space<vmem>>) attributes {dimension_semantics = [#tpu.dimension_semantics<parallel>], iteration_bounds = array<i64: 1>, scalar_prefetch = 0 : i64, scratch_operands = 0 : i64, tpu.core_type = #tpu.core_type<tc>, window_params = [{transform_indices = @transform_0, window_bounds = array<i64: 8, 32>}, {transform_indices = @transform_1, window_bounds = array<i64: 8, 6>}, {pipeline_mode = #tpu.pipeline_mode<synchronous>, transform_indices = @transform_2, window_bounds = array<i64: 32, 32>}, {pipeline_mode = #tpu.pipeline_mode<synchronous>, transform_indices = @transform_3, window_bounds = array<i64: 6, 32>}, {pipeline_mode = #tpu.pipeline_mode<synchronous>, transform_indices = @transform_4, window_bounds = array<i64: 1, 32>}, {pipeline_mode = #tpu.pipeline_mode<synchronous>, transform_indices = @transform_5, window_bounds = array<i64: 32, 32>}, {pipeline_mode = #tpu.pipeline_mode<synchronous>, transform_indices = @transform_6, window_bounds = array<i64: 1, 32>}, {pipeline_mode = #tpu.pipeline_mode<synchronous>, transform_indices = @transform_7, window_bounds = array<i64: 1, 32>}, {pipeline_mode = #tpu.pipeline_mode<synchronous>, transform_indices = @transform_8, window_bounds = array<i64: 1, 1>}, {transform_indices = @transform_9, window_bounds = array<i64: 8, 1>}]} {
    %c0 = arith.constant 0 : index
    %c0_0 = arith.constant 0 : index
    %0 = vector.load %arg1[%c0, %c0_0] : memref<8x32xf32, #tpu.memory_space<vmem>>, vector<8x32xf32>
    %1 = arith.truncf %0 : vector<8x32xf32> to vector<8x32xbf16>
    %c0_1 = arith.constant 0 : index
    %c0_2 = arith.constant 0 : index
    %2 = vector.load %arg2[%c0_1, %c0_2] : memref<8x6xf32, #tpu.memory_space<vmem>>, vector<8x6xf32>
    %3 = arith.truncf %2 : vector<8x6xf32> to vector<8x6xbf16>
    %c0_3 = arith.constant 0 : index
    %c0_4 = arith.constant 0 : index
    %4 = vector.load %arg3[%c0_3, %c0_4] : memref<32x32xbf16, #tpu.memory_space<vmem>>, vector<32x32xbf16>
    %cst = arith.constant dense<0.000000e+00> : vector<8x32xf32>
    %5 = tpu.matmul %1, %4, %cst {dimension_numbers = #tpu.dot_dimension_numbers<[1], [0], [0], [1], [0, 0, 1, 1], [], []>} : vector<8x32xbf16>, vector<32x32xbf16>, vector<8x32xf32> -> vector<8x32xf32>
    %c0_5 = arith.constant 0 : index
    %c0_6 = arith.constant 0 : index
    %6 = vector.load %arg4[%c0_5, %c0_6] : memref<6x32xbf16, #tpu.memory_space<vmem>>, vector<6x32xbf16>
    %cst_7 = arith.constant dense<0.000000e+00> : vector<8x32xf32>
    %7 = tpu.matmul %3, %6, %cst_7 {dimension_numbers = #tpu.dot_dimension_numbers<[1], [0], [0], [1], [0, 0, 1, 1], [], []>} : vector<8x6xbf16>, vector<6x32xbf16>, vector<8x32xf32> -> vector<8x32xf32>
    %8 = arith.addf %5, %7 : vector<8x32xf32>
    %c0_8 = arith.constant 0 : index
    %c0_9 = arith.constant 0 : index
    %9 = vector.load %arg5[%c0_8, %c0_9] : memref<1x32xf32, #tpu.memory_space<vmem>>, vector<1x32xf32>
    %10 = vector.broadcast %9 : vector<1x32xf32> to vector<8x32xf32>
    %11 = arith.addf %8, %10 : vector<8x32xf32>
    %cst_10 = arith.constant 0.000000e+00 : f32
    %12 = vector.broadcast %cst_10 : f32 to vector<8x32xf32>
    %13 = arith.maximumf %11, %12 : vector<8x32xf32>
    %14 = arith.truncf %13 : vector<8x32xf32> to vector<8x32xbf16>
    %c0_11 = arith.constant 0 : index
    %c0_12 = arith.constant 0 : index
    %15 = vector.load %arg6[%c0_11, %c0_12] : memref<32x32xbf16, #tpu.memory_space<vmem>>, vector<32x32xbf16>
    %cst_13 = arith.constant dense<0.000000e+00> : vector<8x32xf32>
    %16 = tpu.matmul %14, %15, %cst_13 {dimension_numbers = #tpu.dot_dimension_numbers<[1], [0], [0], [1], [0, 0, 1, 1], [], []>} : vector<8x32xbf16>, vector<32x32xbf16>, vector<8x32xf32> -> vector<8x32xf32>
    %c0_14 = arith.constant 0 : index
    %c0_15 = arith.constant 0 : index
    %17 = vector.load %arg7[%c0_14, %c0_15] : memref<1x32xf32, #tpu.memory_space<vmem>>, vector<1x32xf32>
    %18 = vector.broadcast %17 : vector<1x32xf32> to vector<8x32xf32>
    %19 = arith.addf %16, %18 : vector<8x32xf32>
    %cst_16 = arith.constant 0.000000e+00 : f32
    %20 = vector.broadcast %cst_16 : f32 to vector<8x32xf32>
    %21 = arith.maximumf %19, %20 : vector<8x32xf32>
    %c0_17 = arith.constant 0 : index
    %c0_18 = arith.constant 0 : index
    %22 = vector.load %arg8[%c0_17, %c0_18] : memref<1x32xf32, #tpu.memory_space<vmem>>, vector<1x32xf32>
    %23 = vector.broadcast %22 : vector<1x32xf32> to vector<8x32xf32>
    %24 = arith.mulf %21, %23 : vector<8x32xf32>
    %cst_19 = arith.constant dense<0.000000e+00> : vector<8xf32>
    %25 = vector.multi_reduction <add>, %24, %cst_19 [1] : vector<8x32xf32> to vector<8xf32>
    %26 = vector.shape_cast %25 : vector<8xf32> to vector<8x1xf32>
    %c0_20 = arith.constant 0 : index
    %c0_21 = arith.constant 0 : index
    %27 = vector.load %arg9[%c0_20, %c0_21] : memref<1x1xf32, #tpu.memory_space<vmem>>, vector<1x1xf32>
    %28 = vector.broadcast %27 : vector<1x1xf32> to vector<8x1xf32>
    %29 = arith.addf %26, %28 : vector<8x1xf32>
    %c0_22 = arith.constant 0 : index
    %c0_23 = arith.constant 0 : index
    %30 = vector.load %arg10[%c0_22, %c0_23] : memref<8x1xf32, #tpu.memory_space<vmem>>, vector<8x1xf32>
    tpu.vector_store %arg10[%c0_22, %c0_23], %29 {strides = array<i32>} : memref<8x1xf32, #tpu.memory_space<vmem>>, vector<8x1xf32>,
    return
  }
  func.func @transform_0(%arg0: i32) -> (i32, i32) {
    %c0_i32 = arith.constant 0 : i32
    %c0_i32_0 = arith.constant 0 : i32
    return %arg0, %c0_i32 : i32, i32
  }
  func.func @transform_1(%arg0: i32) -> (i32, i32) {
    %c0_i32 = arith.constant 0 : i32
    %c0_i32_0 = arith.constant 0 : i32
    return %arg0, %c0_i32 : i32, i32
  }
  func.func @transform_2(%arg0: i32) -> (i32, i32) {
    %c0_i32 = arith.constant 0 : i32
    %c0_i32_0 = arith.constant 0 : i32
    %c0_i32_1 = arith.constant 0 : i32
    return %c0_i32, %c0_i32_0 : i32, i32
  }
  func.func @transform_3(%arg0: i32) -> (i32, i32) {
    %c0_i32 = arith.constant 0 : i32
    %c0_i32_0 = arith.constant 0 : i32
    %c0_i32_1 = arith.constant 0 : i32
    return %c0_i32, %c0_i32_0 : i32, i32
  }
  func.func @transform_4(%arg0: i32) -> (i32, i32) {
    %c0_i32 = arith.constant 0 : i32
    %c0_i32_0 = arith.constant 0 : i32
    %c0_i32_1 = arith.constant 0 : i32
    return %c0_i32, %c0_i32_0 : i32, i32
  }
  func.func @transform_5(%arg0: i32) -> (i32, i32) {
    %c0_i32 = arith.constant 0 : i32
    %c0_i32_0 = arith.constant 0 : i32
    %c0_i32_1 = arith.constant 0 : i32
    return %c0_i32, %c0_i32_0 : i32, i32
  }
  func.func @transform_6(%arg0: i32) -> (i32, i32) {
    %c0_i32 = arith.constant 0 : i32
    %c0_i32_0 = arith.constant 0 : i32
    %c0_i32_1 = arith.constant 0 : i32
    return %c0_i32, %c0_i32_0 : i32, i32
  }
  func.func @transform_7(%arg0: i32) -> (i32, i32) {
    %c0_i32 = arith.constant 0 : i32
    %c0_i32_0 = arith.constant 0 : i32
    %c0_i32_1 = arith.constant 0 : i32
    return %c0_i32, %c0_i32_0 : i32, i32
  }
  func.func @transform_8(%arg0: i32) -> (i32, i32) {
    %c0_i32 = arith.constant 0 : i32
    %c0_i32_0 = arith.constant 0 : i32
    %c0_i32_1 = arith.constant 0 : i32
    return %c0_i32, %c0_i32_0 : i32, i32
  }
  func.func @transform_9(%arg0: i32) -> (i32, i32) {
    %c0_i32 = arith.constant 0 : i32
    %c0_i32_0 = arith.constant 0 : i32
    return %arg0, %c0_i32 : i32, i32
  }
}

</mosaic_0001>

<bundles_post_ra>
// kernel: tpu_custom_call.1
= control target key start
LH: loop header
LB: loop body
LE: loop exit
PB: predicated region body
PF: predicated region fallthrough
CT: control target
= control target key end

     0   :  { %s534_s0 = inlined_call_operand.hbm [shape: f32[8,32], index: 0, kind: input, shape index: {}]   ;;  %s535_s1 = inlined_call_operand.hbm [shape: f32[8,6], index: 1, kind: input, shape index: {}]   ;;  %s536_s2 = inlined_call_operand.hbm [shape: bf16[32,32], index: 2, kind: input, shape index: {}]   ;;  %s537_s3 = inlined_call_operand.vmem [shape: bf16[6,32], index: 3, kind: input, shape index: {}]   ;;  %s538_s4 = inlined_call_operand.vmem [shape: f32[1,32], index: 4, kind: input, shape index: {}]   ;;  %s539_s5 = inlined_call_operand.vmem [shape: bf16[32,32], index: 5, kind: input, shape index: {}]   ;;  %s540_s6 = inlined_call_operand.vmem [shape: f32[1,32], index: 6, kind: input, shape index: {}]   ;;  %s541_s7 = inlined_call_operand.vmem [shape: f32[1,32], index: 7, kind: input, shape index: {}]   ;;  %s542_s8 = inlined_call_operand.<no memory space> [shape: f32[1,1], index: 8, kind: input, shape index: {}]   ;;  %s543_s9 = inlined_call_operand.vmem [shape: f32[8,1], index: 9, kind: output, shape index: {}]  }
   0x1   :  { %v14_v0 = vstv %s542_s8 }
   0x2   :  { %15 = vst [vmem:[#allocation2] sm:$0x1] %v14_v0 }
   0x3   :  { %16 = vsyncpa [#allocation4], 0 }
   0x4   :  { %17 = vsyncpa [#allocation6], 0  ;;  %s411_s11 = smov [#allocation5]   ;;  %s412_s13 = smov [#allocation3]  }
   0x5   :  { %s34_s12 = sshll.u32 %s411_s11, 4  ;;  %s24_s14 = sshll.u32 %s412_s13, 4  ;;  %s35_s12 = int_to_ptr.vmem [resolvable:$true] %s34_s12  ;;  %s25_s14 = int_to_ptr.vmem [resolvable:$true] %s24_s14 }
   0x6   :  { %s341_s17 = scalar_lea.hbm %s535_s1, 128 }
   0x7   :  { %p342_p0 = scmp.ne.s32.totalorder %s535_s1, %s341_s17  ;;  %p345_p1 = scmp.lt.u32.totalorder %s341_s17, %s535_s1 }
   0x9   :  { %p347_p2 = pnand %p345_p1, %p342_p0 }
   0xb   :  { %350 = shalt.err (!%p347_p2)
}
   0xc   :  { %s351_s8 = scalar_lea.vmem %s35_s12, 128  ;;  %p356_p4 = scmp.lt.s32.totalorder %s35_s12, %s35_s12 }
   0xd   :  { %p352_p3 = scmp.ne.s32.totalorder %s35_s12, %s351_s8  ;;  %p357_p5 = scmp.lt.s32.totalorder %s351_s8, %s351_s8 }
   0xf   :  { %p358_p6 = por %p357_p5, %p356_p4 }
  0x11   :  { %p359_p7 = pnand %p358_p6, %p352_p3 }
  0x13   :  { %362 = shalt.err (!%p359_p7)
}
  0x14   :  { %37 = dma.hbm_to_vmem [thread:$0]  %s535_s1, 128, %s35_s12, [#allocation6]  }
  0x15   :  { %s363_s26 = scalar_lea.hbm %s534_s0, 128 }
  0x16   :  { %p364_p8 = scmp.ne.s32.totalorder %s534_s0, %s363_s26  ;;  %p367_p9 = scmp.lt.u32.totalorder %s363_s26, %s534_s0 }
  0x18   :  { %p369_p10 = pnand %p367_p9, %p364_p8 }
  0x1a   :  { %372 = shalt.err (!%p369_p10)
}
  0x1b   :  { %s373_s10 = scalar_lea.vmem %s25_s14, 128  ;;  %p378_p12 = scmp.lt.s32.totalorder %s25_s14, %s25_s14 }
  0x1c   :  { %p374_p11 = scmp.ne.s32.totalorder %s25_s14, %s373_s10  ;;  %p379_p13 = scmp.lt.s32.totalorder %s373_s10, %s373_s10 }
  0x1e   :  { %p380_p0 = por %p379_p13, %p378_p12 }
  0x20   :  { %p381_p1 = pnand %p380_p0, %p374_p11 }
  0x22   :  { %384 = shalt.err (!%p381_p1)
}
  0x23   :  { %27 = dma.hbm_to_vmem [thread:$0]  %s534_s0, 128, %s25_s14, [#allocation4]  }
  0x24   :  { %s413_s12 = smov [#allocation7]   ;;  %s385_s17 = scalar_lea.hbm %s536_s2, 256 }
  0x25   :  { %s43_s13 = sshll.u32 %s413_s12, 4  ;;  %p386_p2 = scmp.ne.s32.totalorder %s536_s2, %s385_s17  ;;  %s44_s13 = int_to_ptr.vmem [resolvable:$true] %s43_s13 }
  0x26   :  { %p389_p3 = scmp.lt.u32.totalorder %s385_s17, %s536_s2 }
  0x28   :  { %p391_p4 = pnand %p389_p3, %p386_p2 }
  0x2a   :  { %394 = shalt.err (!%p391_p4)
}
  0x2b   :  { %s395_s8 = scalar_lea.vmem %s44_s13, 256  ;;  %p400_p6 = scmp.lt.s32.totalorder %s44_s13, %s44_s13 }
  0x2c   :  { %p396_p5 = scmp.ne.s32.totalorder %s44_s13, %s395_s8  ;;  %p401_p7 = scmp.lt.s32.totalorder %s395_s8, %s395_s8 }
  0x2e   :  { %p402_p8 = por %p401_p7, %p400_p6 }
  0x30   :  { %p403_p9 = pnand %p402_p8, %p396_p5 }
  0x32   :  { %406 = shalt.err (!%p403_p9)
}
  0x33   :  { %s414_s0 = smov 64   ;;  %s415_s14 = smov 4  }
  0x34   :  { %49 = dma.hbm_to_vmem [thread:$0]  %s536_s2, 256, %s44_s13, [#allocation6], %s414_s0, %s414_s0, %s415_s14  }
  0x35   :  { %407 = dma.done.wait [#allocation4], 128  }
  0x36   :  { %408 = vsyncadd [#allocation4], 4294967168 }
  0x37   :  { %409 = dma.done.wait [#allocation6], 384  }
  0x38   :  { %410 = vsyncadd [#allocation6], 4294966912  ;;  %v416_v1 = vmov 0.0   ;;  %vm417_vm0 = vmmov 0   ;;  %vm85_vm1 = vcmask 1042432   ;;  %v337_v2 = vld [vmem:[#allocation7] sm:$0xff]  }
  0x39   :  { %314 = vmatprep.subr.bf16.mxu1 %v416_v1  ;;  %308 = vmatprep.subr.bf16.mxu0 %v416_v1  ;;  %v80_v3 = vld [vmem:[%s537_s3] sm:$0x7]  ;;  %v74_v4 = vld [vmem:[#allocation5] sm:$0xff]  ;;  %vm81_vm2 = vcmask 48128   ;;  %vm141_vm3 = vcmask 261120   ;;  %vm281_vm4 = vcmask 7168  }
  0x3a   :  { %310 = vmatprep.mubr.msk.bf16.mxu0 %vm417_vm0, %v416_v1  ;;  %318 = vmatprep.mubr.msk.bf16.mxu1 %vm417_vm0, %v416_v1  ;;  %v87_v5 = vsel %vm85_vm1, %v80_v3, 0  ;;  %v75_v6 = vpack.c.bf16 %v74_v4, %v74_v4  ;;  %v338_v7 = vld [vmem:[#allocation7 + $0x8] sm:$0xff]   ;;  %v72_v8 = vld [vmem:[#allocation3] sm:$0xff] }
  0x3b   :  { %315 = vmatpush3.bf16.msra.mxu1 %v337_v2  ;;  %309 = vmatpush3.bf16.msra.mxu0 %v87_v5  ;;  %v73_v9 = vpack.c.bf16 %v72_v8, %v72_v8  ;;  %v339_v10 = vld [vmem:[%s539_s5] sm:$0xff]   ;;  %v340_v11 = vld [vmem:[%s539_s5 + $0x8] sm:$0xff]  }
  0x3c   :  { %316 = vmatprep.subr.bf16.mxu1 %v416_v1  ;;  %322 = vmatprep.subr.bf16.mxu0 %v416_v1  ;;  %v293_v17 = vld [vmem:[%s538_s4] ss:$0 sm:$0xff] }
  0x3d   :  { %v294_v25 = vld [vmem:[%s540_s6] ss:$0 sm:$0xff] }
  0x3e   :  { %311 = vmatmul.mubr.msk.bf16.vlgmr.msra.gmra.mrb[0].mxu0 %vm81_vm2, %v75_v6  ;;  %v298_v30 = vld [vmem:[%s541_s7] ss:$0 sm:$0xff] }
  0x3f   :  { %317 = vmatpush3.bf16.msra.mxu1 %v338_v7  ;;  %326 = vmatprep.mubr.msk.bf16.mxu0 %vm417_vm0, %v416_v1  ;;  %v299_v35 = vld [vmem:[#allocation2] ss:$0 sm:$0xff] }
  0x40   :  { %323 = vmatpush3.bf16.msra.mxu0 %v339_v10 }
  0x41   :  { %324 = vmatprep.subr.bf16.mxu0 %v416_v1 }
  0x42   :  { %319 = vmatmul.mubr.msk.bf16.vlgmr.msra.gmra.mrb[0].mxu1 %vm141_vm3, %v73_v9 }
  0x44   :  { %325 = vmatpush3.bf16.msra.mxu0 %v340_v11 }
 0x111   :  { %v123_v12 = vpop.f32.mrb[0].mxu0 }
 0x112   :  { %v312_v13 = vpop.f32.mrb[1].mxu0 }
 0x113   :  { %v126_v14 = vpop.f32.mrb[2].mxu0 }
 0x114   :  { %v313_v15 = vpop.f32.mrb[3].mxu0 }
 0x115   :  { %v179_v16 = vpop.f32.mrb[0].mxu1 }
 0x116   :  { %v180_v18 = vadd.f32 %v179_v16, %v123_v12  ;;  %v320_v19 = vpop.f32.mrb[1].mxu1 }
 0x117   :  { %v182_v20 = vpop.f32.mrb[2].mxu1 }
 0x118   :  { %v192_v21 = vadd.f32 %v293_v17, %v180_v18  ;;  %v321_v22 = vpop.f32.mrb[3].mxu1 }
 0x11a   :  { %v193_v23 = vmax.f32 %v192_v21, 0.0 }
 0x11c   :  { %v194_v24 = vpack.c.bf16 %v193_v23, %v193_v23 }
 0x11e   :  { %327 = vmatmul.mubr.msk.bf16.vlgmr.msra.gmra.mrb[4].mxu0 %vm141_vm3, %v194_v24 }
 0x1f1   :  { %v255_v26 = vpop.f32.mrb[4].mxu0 }
 0x1f2   :  { %v256_v27 = vadd.f32 %v294_v25, %v255_v26  ;;  %v328_v28 = vpop.f32.mrb[5].mxu0 }
 0x1f3   :  { %v258_v29 = vpop.f32.mrb[6].mxu0 }
 0x1f4   :  { %v261_v31 = vmax.f32 %v256_v27, 0.0  ;;  %v329_v32 = vpop.f32.mrb[7].mxu0 }
 0x1f6   :  { %v269_v33 = vmul.f32 %v298_v30, %v261_v31 }
 0x1f8   :  { %v270_v34 = vsel %vm141_vm3, %v269_v33, 0.0 }
 0x1f9   :  { %271 = vadd.xlane.f32.xlu0 %v270_v34 }
 0x286   :  { %v272_v36 = vpop.xlane.xlu0 %271 }
 0x287   :  { %v280_v37 = vadd.f32 %v299_v35, %v272_v36 }
 0x289   :  { %282 = vst.msk [vmem:[%s543_s9] sm:$0xff] %vm281_vm4, %v280_v37 }
 0x28a   :  { %287 = vsyncpa [#allocation4], 1 }
 0x28b   :  { %288 = vsyncpa [#allocation6], 1 }

</bundles_post_ra>
